<compile_context>
chip_gen: v6e
topology: v6e:2x2x1
jax: 0.10.0
libtpu: 0.0.40
codegen_flags: <defaults>
</compile_context>

<pallas_src>
import math
from functools import partial

import jax
import jax.numpy as jnp
from jax.experimental import pallas as pl
from jax.experimental.pallas import tpu as pltpu

CONTEXT = 256      # hidden width of RRDModel
LANE = 128
SUBLANE = 8


def _round_up(x, m):
    return ((x + m - 1) // m) * m


# ----------------------------------------------------------------------------
# Fused MLP kernel for one batch tile:
#   out = relu(relu(x @ W1 + b1) @ W2 + b2) · w3_row + b3
# Layer 3 is a VPU mul + XLU lane-reduce (out_dim == 1), not an MXU matmul.
# ----------------------------------------------------------------------------
def rrd_mlp_kernel(x_ref, w1_ref, b1_ref, w2_ref, b2_ref, w3_ref, b3_ref, o_ref):
    h1 = jnp.dot(x_ref[...], w1_ref[...], preferred_element_type=jnp.float32)
    h1 = jnp.maximum(h1 + b1_ref[...], 0.0)                       # (TB, C) f32

    h2 = jnp.dot(h1.astype(w2_ref.dtype), w2_ref[...],
                 preferred_element_type=jnp.float32)
    h2 = jnp.maximum(h2 + b2_ref[...], 0.0)                       # (TB, C) f32

    # fc3: single output unit -> elementwise mul + lane reduction + SMEM bias.
    o_ref[...] = (jnp.sum(h2 * w3_ref[...], axis=-1, keepdims=True)
                  + b3_ref[0, 0])                                 # (TB, 1)


# ----------------------------------------------------------------------------
# One-time parameter preparation (transpose / pad / cast) — outside hot path.
# PyTorch nn.Linear layout in:  w: (out, in), b: (out,)
# ----------------------------------------------------------------------------
def prepare_params(params, in_dim, dtype=jnp.float32):
    C = params["w1"].shape[0]
    k_pad = _round_up(in_dim, LANE)

    w1_t = jnp.zeros((k_pad, C), dtype)
    w1_t = w1_t.at[:in_dim, :].set(
        jnp.asarray(params["w1"], jnp.float32).T.astype(dtype))   # (Kp, C)
    w2_t = jnp.asarray(params["w2"], jnp.float32).T.astype(dtype)  # (C, C)
    w3_row = jnp.asarray(params["w3"], jnp.float32).reshape(1, C)  # (1, C) f32
    b1 = jnp.asarray(params["b1"], jnp.float32).reshape(1, C)
    b2 = jnp.asarray(params["b2"], jnp.float32).reshape(1, C)
    b3 = jnp.asarray(params["b3"], jnp.float32).reshape(1, 1)
    return {"w1_t": w1_t, "b1": b1, "w2_t": w2_t, "b2": b2,
            "w3_row": w3_row, "b3": b3}


# ----------------------------------------------------------------------------
# Jitted forward: pad x once, run a 1-D parallel grid over batch tiles.
# ----------------------------------------------------------------------------
@partial(jax.jit, static_argnames=("block_b",))
def _rrd_forward(x, w1_t, b1, w2_t, b2, w3_row, b3, *, block_b):
    B, D = x.shape
    k_pad, C = w1_t.shape
    b_pad = _round_up(B, block_b)
    grid = (b_pad // block_b,)

    xp = jnp.pad(x.astype(w1_t.dtype), ((0, b_pad - B), (0, k_pad - D)))

    itm = lambda a: int(a.size) * a.dtype.itemsize
    cost = pl.CostEstimate(
        flops=2 * b_pad * (k_pad * C + C * C + C),
        transcendentals=0,
        bytes_accessed=int(itm(xp) + itm(w1_t) + itm(b1) + itm(w2_t) + itm(b2)
                           + itm(w3_row) + itm(b3) + b_pad * 4),
    )

    out = pl.pallas_call(
        rrd_mlp_kernel,
        out_shape=jax.ShapeDtypeStruct((b_pad, 1), jnp.float32),
        grid_spec=pltpu.PrefetchScalarGridSpec(
            num_scalar_prefetch=0,
            grid=grid,
            in_specs=[
                pl.BlockSpec((block_b, k_pad), lambda i: (i, 0)),   # x tile
                pl.BlockSpec((k_pad, C), lambda i: (0, 0)),         # W1 (resident)
                pl.BlockSpec((1, C), lambda i: (0, 0)),             # b1
                pl.BlockSpec((C, C), lambda i: (0, 0)),             # W2 (resident)
                pl.BlockSpec((1, C), lambda i: (0, 0)),             # b2
                pl.BlockSpec((1, C), lambda i: (0, 0)),             # w3 row
                pl.BlockSpec(memory_space=pltpu.MemorySpace.SMEM),  # b3 scalar
            ],
            out_specs=pl.BlockSpec((block_b, 1), lambda i: (i, 0)),
        ),
        compiler_params=pltpu.CompilerParams(
            dimension_semantics=("parallel",)),
        cost_estimate=cost,
    )(xp, w1_t, b1, w2_t, b2, w3_row, b3)

    return out[:B]


def rrd_forward(x, prepped):
    B = x.shape[0]
    block_b = min(128, _round_up(max(B, SUBLANE), SUBLANE))
    return _rrd_forward(x, prepped["w1_t"], prepped["b1"], prepped["w2_t"],
                        prepped["b2"], prepped["w3_row"], prepped["b3"],
                        block_b=block_b)


# ----------------------------------------------------------------------------
# Pure-JAX reference (same math as the PyTorch module) for correctness checks.
# ----------------------------------------------------------------------------
def reference_forward(x, p):
    h1 = jnp.maximum(x @ p["w1"].T + p["b1"], 0.0)
    h2 = jnp.maximum(h1 @ p["w2"].T + p["b2"], 0.0)
    return h2 @ p["w3"].T + p["b3"]


if __name__ == "__main__":
    # Shapes implied by RRDModel on a small MuJoCo-style env:
    #   input_shape = 2*obs_dim + act_dim, contextSize = 256, output = 1
    OBS_DIM, ACT_DIM = 11, 3
    IN_DIM = 2 * OBS_DIM + ACT_DIM       # 25

    key = jax.random.PRNGKey(0)
    kx, k1, k2, k3 = jax.random.split(key, 4)

    def xavier(k, out_dim, in_dim):
        bound = math.sqrt(6.0 / (in_dim + out_dim))
        return jax.random.uniform(k, (out_dim, in_dim), jnp.float32, -bound, bound)

    params = {
        "w1": xavier(k1, CONTEXT, IN_DIM),
        "b1": jnp.full((CONTEXT,), 0.1, jnp.float32),   # layer_init bias_const=0.1
        "w2": xavier(k2, CONTEXT, CONTEXT),
        "b2": jnp.full((CONTEXT,), 0.1, jnp.float32),
        "w3": xavier(k3, 1, CONTEXT),
        "b3": jnp.full((1,), 0.1, jnp.float32),
    }

    # One-time prep (transposed/padded weights) — stays out of the hot path.
    prepped = prepare_params(params, IN_DIM)

    # Check 1: small batch (gridless path, block_b == 8).
    x_small = jax.random.normal(kx, (8, IN_DIM), jnp.float32)
    out_s = jax.block_until_ready(rrd_forward(x_small, prepped))
    ref_s = jax.block_until_ready(reference_forward(x_small, params))
    assert out_s.shape == (8, 1), out_s.shape
    assert jnp.allclose(out_s, ref_s, rtol=1e-4, atol=1e-4)

    # Check 2: larger batch (two 128-row tiles + remainder padding).
    x_big = jax.random.normal(kx, (200, IN_DIM), jnp.float32)
    out_b = jax.block_until_ready(rrd_forward(x_big, prepped))
    ref_b = jax.block_until_ready(reference_forward(x_big, params))
    assert out_b.shape == (200, 1), out_b.shape
    assert jnp.allclose(out_b, ref_b, rtol=1e-4, atol=1e-4)

    print("KERNEL_OK")
</pallas_src>

<mosaic_0001>
module attributes {stable_mosaic.version = 11 : i64} {
  func.func @rrd_mlp_kernel(%arg0: i32, %arg1: memref<8x128xf32, #tpu.memory_space<vmem>>, %arg2: memref<128x256xf32, #tpu.memory_space<vmem>>, %arg3: memref<1x256xf32, #tpu.memory_space<vmem>>, %arg4: memref<256x256xf32, #tpu.memory_space<vmem>>, %arg5: memref<1x256xf32, #tpu.memory_space<vmem>>, %arg6: memref<1x256xf32, #tpu.memory_space<vmem>>, %arg7: memref<1x1xf32, #tpu.memory_space<smem>>, %arg8: memref<8x1xf32, #tpu.memory_space<vmem>>) attributes {dimension_semantics = [#tpu.dimension_semantics<parallel>], iteration_bounds = array<i64: 1>, scalar_prefetch = 0 : i64, scratch_operands = 0 : i64, tpu.core_type = #tpu.core_type<tc>, window_params = [{transform_indices = @transform_0, window_bounds = array<i64: 8, 128>}, {pipeline_mode = #tpu.pipeline_mode<synchronous>, transform_indices = @transform_1, window_bounds = array<i64: 128, 256>}, {pipeline_mode = #tpu.pipeline_mode<synchronous>, transform_indices = @transform_2, window_bounds = array<i64: 1, 256>}, {pipeline_mode = #tpu.pipeline_mode<synchronous>, transform_indices = @transform_3, window_bounds = array<i64: 256, 256>}, {pipeline_mode = #tpu.pipeline_mode<synchronous>, transform_indices = @transform_4, window_bounds = array<i64: 1, 256>}, {pipeline_mode = #tpu.pipeline_mode<synchronous>, transform_indices = @transform_5, window_bounds = array<i64: 1, 256>}, {transform_indices = @transform_6, window_bounds = array<i64: 1, 1>}, {transform_indices = @transform_7, window_bounds = array<i64: 8, 1>}]} {
    %c0 = arith.constant 0 : index
    %c0_0 = arith.constant 0 : index
    %0 = vector.load %arg1[%c0, %c0_0] : memref<8x128xf32, #tpu.memory_space<vmem>>, vector<8x128xf32>
    %c0_1 = arith.constant 0 : index
    %c0_2 = arith.constant 0 : index
    %1 = vector.load %arg2[%c0_1, %c0_2] : memref<128x256xf32, #tpu.memory_space<vmem>>, vector<128x256xf32>
    %cst = arith.constant dense<0.000000e+00> : vector<8x256xf32>
    %2 = tpu.matmul %0, %1, %cst {dimension_numbers = #tpu.dot_dimension_numbers<[1], [0], [0], [1], [0, 0, 1, 1], [], []>} : vector<8x128xf32>, vector<128x256xf32>, vector<8x256xf32> -> vector<8x256xf32>
    %c0_3 = arith.constant 0 : index
    %c0_4 = arith.constant 0 : index
    %3 = vector.load %arg3[%c0_3, %c0_4] : memref<1x256xf32, #tpu.memory_space<vmem>>, vector<1x256xf32>
    %4 = vector.broadcast %3 : vector<1x256xf32> to vector<8x256xf32>
    %5 = arith.addf %2, %4 : vector<8x256xf32>
    %cst_5 = arith.constant 0.000000e+00 : f32
    %6 = vector.broadcast %cst_5 : f32 to vector<8x256xf32>
    %7 = arith.maximumf %5, %6 : vector<8x256xf32>
    %c0_6 = arith.constant 0 : index
    %c0_7 = arith.constant 0 : index
    %8 = vector.load %arg4[%c0_6, %c0_7] : memref<256x256xf32, #tpu.memory_space<vmem>>, vector<256x256xf32>
    %cst_8 = arith.constant dense<0.000000e+00> : vector<8x256xf32>
    %9 = tpu.matmul %7, %8, %cst_8 {dimension_numbers = #tpu.dot_dimension_numbers<[1], [0], [0], [1], [0, 0, 1, 1], [], []>} : vector<8x256xf32>, vector<256x256xf32>, vector<8x256xf32> -> vector<8x256xf32>
    %c0_9 = arith.constant 0 : index
    %c0_10 = arith.constant 0 : index
    %10 = vector.load %arg5[%c0_9, %c0_10] : memref<1x256xf32, #tpu.memory_space<vmem>>, vector<1x256xf32>
    %11 = vector.broadcast %10 : vector<1x256xf32> to vector<8x256xf32>
    %12 = arith.addf %9, %11 : vector<8x256xf32>
    %cst_11 = arith.constant 0.000000e+00 : f32
    %13 = vector.broadcast %cst_11 : f32 to vector<8x256xf32>
    %14 = arith.maximumf %12, %13 : vector<8x256xf32>
    %c0_12 = arith.constant 0 : index
    %c0_13 = arith.constant 0 : index
    %15 = vector.load %arg6[%c0_12, %c0_13] : memref<1x256xf32, #tpu.memory_space<vmem>>, vector<1x256xf32>
    %16 = vector.broadcast %15 : vector<1x256xf32> to vector<8x256xf32>
    %17 = arith.mulf %14, %16 : vector<8x256xf32>
    %cst_14 = arith.constant dense<0.000000e+00> : vector<8xf32>
    %18 = vector.multi_reduction <add>, %17, %cst_14 [1] : vector<8x256xf32> to vector<8xf32>
    %19 = vector.shape_cast %18 : vector<8xf32> to vector<8x1xf32>
    %c0_15 = arith.constant 0 : index
    %c0_16 = arith.constant 0 : index
    %20 = memref.load %arg7[%c0_15, %c0_16] : memref<1x1xf32, #tpu.memory_space<smem>>
    %21 = vector.broadcast %20 : f32 to vector<8x1xf32>
    %22 = arith.addf %19, %21 : vector<8x1xf32>
    %c0_17 = arith.constant 0 : index
    %c0_18 = arith.constant 0 : index
    %23 = vector.load %arg8[%c0_17, %c0_18] : memref<8x1xf32, #tpu.memory_space<vmem>>, vector<8x1xf32>
    tpu.vector_store %arg8[%c0_17, %c0_18], %22 {strides = array<i32>} : memref<8x1xf32, #tpu.memory_space<vmem>>, vector<8x1xf32>,
    return
  }
  func.func @transform_0(%arg0: i32) -> (i32, i32) {
    %c0_i32 = arith.constant 0 : i32
    %c0_i32_0 = arith.constant 0 : i32
    return %arg0, %c0_i32 : i32, i32
  }
  func.func @transform_1(%arg0: i32) -> (i32, i32) {
    %c0_i32 = arith.constant 0 : i32
    %c0_i32_0 = arith.constant 0 : i32
    %c0_i32_1 = arith.constant 0 : i32
    return %c0_i32, %c0_i32_0 : i32, i32
  }
  func.func @transform_2(%arg0: i32) -> (i32, i32) {
    %c0_i32 = arith.constant 0 : i32
    %c0_i32_0 = arith.constant 0 : i32
    %c0_i32_1 = arith.constant 0 : i32
    return %c0_i32, %c0_i32_0 : i32, i32
  }
  func.func @transform_3(%arg0: i32) -> (i32, i32) {
    %c0_i32 = arith.constant 0 : i32
    %c0_i32_0 = arith.constant 0 : i32
    %c0_i32_1 = arith.constant 0 : i32
    return %c0_i32, %c0_i32_0 : i32, i32
  }
  func.func @transform_4(%arg0: i32) -> (i32, i32) {
    %c0_i32 = arith.constant 0 : i32
    %c0_i32_0 = arith.constant 0 : i32
    %c0_i32_1 = arith.constant 0 : i32
    return %c0_i32, %c0_i32_0 : i32, i32
  }
  func.func @transform_5(%arg0: i32) -> (i32, i32) {
    %c0_i32 = arith.constant 0 : i32
    %c0_i32_0 = arith.constant 0 : i32
    %c0_i32_1 = arith.constant 0 : i32
    return %c0_i32, %c0_i32_0 : i32, i32
  }
  func.func @transform_6(%arg0: i32) -> (i32, i32) {
    %c0_i32 = arith.constant 0 : i32
    %c0_i32_0 = arith.constant 0 : i32
    %c0_i32_1 = arith.constant 0 : i32
    return %c0_i32, %c0_i32_0 : i32, i32
  }
  func.func @transform_7(%arg0: i32) -> (i32, i32) {
    %c0_i32 = arith.constant 0 : i32
    %c0_i32_0 = arith.constant 0 : i32
    return %arg0, %c0_i32 : i32, i32
  }
}

</mosaic_0001>

<bundles_post_ra>
// kernel: _rrd_forward.1
= control target key start
LH: loop header
LB: loop body
LE: loop exit
PB: predicated region body
PF: predicated region fallthrough
CT: control target
= control target key end

     0   :  { %13 = vsyncpa [#allocation4], 0  ;;  %s468_s0 = inlined_call_operand.vmem [shape: f32[8,128], index: 0, kind: input, shape index: {}]   ;;  %s469_s1 = inlined_call_operand.hbm [shape: f32[128,256], index: 1, kind: input, shape index: {}]   ;;  %s470_s2 = inlined_call_operand.vmem [shape: f32[1,256], index: 2, kind: input, shape index: {}]   ;;  %s471_s3 = inlined_call_operand.hbm [shape: f32[256,256], index: 3, kind: input, shape index: {}]   ;;  %s472_s4 = inlined_call_operand.vmem [shape: f32[1,256], index: 4, kind: input, shape index: {}]   ;;  %s473_s5 = inlined_call_operand.vmem [shape: f32[1,256], index: 5, kind: input, shape index: {}]   ;;  %s474_s6 = inlined_call_operand.<no memory space> [shape: f32[1,1], index: 6, kind: input, shape index: {}]   ;;  %s475_s7 = inlined_call_operand.vmem [shape: f32[8,1], index: 7, kind: output, shape index: {}]  }
   0x1   :  { %14 = vsyncpa [#allocation6], 0  ;;  %s399_s24 = smov [#allocation3]  }
   0x2   :  { %s22_s25 = sshll.u32 %s399_s24, 4  ;;  %s23_s25 = int_to_ptr.vmem [resolvable:$true] %s22_s25 }
   0x3   :  { %s363_s26 = scalar_lea.vmem %s23_s25, 4096  ;;  %p368_p1 = scmp.lt.s32.totalorder %s23_s25, %s23_s25 }
   0x4   :  { %p364_p0 = scmp.ne.s32.totalorder %s23_s25, %s363_s26  ;;  %p369_p2 = scmp.lt.s32.totalorder %s363_s26, %s363_s26 }
   0x6   :  { %p370_p3 = por %p369_p2, %p368_p1 }
   0x8   :  { %p371_p4 = pnand %p370_p3, %p364_p0 }
   0xa   :  { %374 = shalt.err (!%p371_p4)
}
   0xb   :  { %s400_s27 = smov 256   ;;  %s401_s28 = smov 16  }
   0xc   :  { %28 = dma.hbm_to_vmem [thread:$0]  %s469_s1, 4096, %s23_s25, [#allocation4], %s400_s27, %s400_s27, %s401_s28  }
   0xd   :  { %s402_s8 = smov [#allocation5]  }
   0xe   :  { %s36_s9 = sshll.u32 %s402_s8, 4  ;;  %s37_s9 = int_to_ptr.vmem [resolvable:$true] %s36_s9 }
   0xf   :  { %s383_s10 = scalar_lea.vmem %s37_s9, 8192  ;;  %p388_p6 = scmp.lt.s32.totalorder %s37_s9, %s37_s9 }
  0x10   :  { %p384_p5 = scmp.ne.s32.totalorder %s37_s9, %s383_s10  ;;  %p389_p7 = scmp.lt.s32.totalorder %s383_s10, %s383_s10 }
  0x12   :  { %p390_p8 = por %p389_p7, %p388_p6 }
  0x14   :  { %p391_p9 = pnand %p390_p8, %p384_p5 }
  0x16   :  { %394 = shalt.err (!%p391_p9)
}
  0x17   :  { %42 = dma.hbm_to_vmem [thread:$0]  %s471_s3, 8192, %s37_s9, [#allocation6], %s400_s27, %s400_s27, %s401_s28  }
  0x18   :  { %395 = dma.done.wait [#allocation4], 4096  }
  0x19   :  { %396 = vsyncadd [#allocation4], 4294963200 }
  0x1a   :  { %397 = dma.done.wait [#allocation6], 8192  }
  0x1b   :  { %398 = vsyncadd [#allocation6], 4294959104  ;;  %v403_v0 = vmov 0.0   ;;  %v87_v1 = vld [vmem:[#allocation3 + $0xf8] sm:$0xff]  ;;  %v86_v2 = vld [vmem:[#allocation3 + $0xf0] sm:$0xff]  ;;  %vm342_vm0 = vcmask 7168  }
  0x1c   :  { %164 = vmatprep.mubr.f32.mxu0 %v403_v0  ;;  %v85_v3 = vld [vmem:[#allocation3 + $0xe8] sm:$0xff]  ;;  %100 = vmatprep.subr.mxu0 %v87_v1  ;;  %v84_v4 = vld [vmem:[#allocation3 + $0xe0] sm:$0xff]  ;;  %v83_v5 = vld [vmem:[#allocation3 + $0xd8] sm:$0xff] }
  0x1d   :  { %101 = vmatpush1.msra.mxu0 %v86_v2  ;;  %v82_v6 = vld [vmem:[#allocation3 + $0xd0] sm:$0xff]  ;;  %v81_v7 = vld [vmem:[#allocation3 + $0xc8] sm:$0xff]  ;;  %v80_v8 = vld [vmem:[#allocation3 + $0xc0] sm:$0xff] }
  0x1e   :  { %102 = vmatprep.subr.mxu0 %v85_v3  ;;  %v79_v9 = vld [vmem:[#allocation3 + $0xb8] sm:$0xff]  ;;  %v78_v10 = vld [vmem:[#allocation3 + $0xb0] sm:$0xff]  ;;  %v77_v11 = vld [vmem:[#allocation3 + $0xa8] sm:$0xff] }
  0x1f   :  { %103 = vmatpush1.msra.mxu0 %v84_v4  ;;  %v76_v12 = vld [vmem:[#allocation3 + $0xa0] sm:$0xff]  ;;  %v75_v13 = vld [vmem:[#allocation3 + $0x98] sm:$0xff]  ;;  %v74_v14 = vld [vmem:[#allocation3 + $0x90] sm:$0xff] }
  0x20   :  { %104 = vmatprep.subr.mxu0 %v83_v5  ;;  %v204_v15 = vld [vmem:[#allocation5 + $0xf8] sm:$0xff]  ;;  %v203_v16 = vld [vmem:[#allocation5 + $0xf0] sm:$0xff]  ;;  %v202_v17 = vld [vmem:[#allocation5 + $0xe8] sm:$0xff] }
  0x21   :  { %105 = vmatpush1.msra.mxu0 %v82_v6  ;;  %v73_v18 = vld [vmem:[#allocation3 + $0x88] sm:$0xff]  ;;  %249 = vmatprep.subr.mxu1 %v204_v15  ;;  %v201_v19 = vld [vmem:[#allocation5 + $0xe0] sm:$0xff]  ;;  %v200_v21 = vld [vmem:[#allocation5 + $0xd8] sm:$0xff] }
  0x22   :  { %106 = vmatprep.subr.mxu0 %v81_v7  ;;  %v72_v20 = vld [vmem:[#allocation3 + $0x80] sm:$0xff]  ;;  %250 = vmatpush1.msra.mxu1 %v203_v16  ;;  %v71_v22 = vld [vmem:[#allocation3 + $0x78] sm:$0xff]  ;;  %v199_v23 = vld [vmem:[#allocation5 + $0xd0] sm:$0xff] }
  0x23   :  { %107 = vmatpush1.msra.mxu0 %v80_v8  ;;  %251 = vmatprep.subr.mxu1 %v202_v17  ;;  %v70_v24 = vld [vmem:[#allocation3 + $0x70] sm:$0xff]  ;;  %v198_v25 = vld [vmem:[#allocation5 + $0xc8] sm:$0xff]  ;;  %v197_v27 = vld [vmem:[#allocation5 + $0xc0] sm:$0xff] }
  0x24   :  { %108 = vmatprep.subr.mxu0 %v79_v9  ;;  %252 = vmatpush1.msra.mxu1 %v201_v19  ;;  %v69_v26 = vld [vmem:[#allocation3 + $0x68] sm:$0xff]  ;;  %v68_v28 = vld [vmem:[#allocation3 + $0x60] sm:$0xff]  ;;  %v196_v29 = vld [vmem:[#allocation5 + $0xb8] sm:$0xff] }
  0x25   :  { %109 = vmatpush1.msra.mxu0 %v78_v10  ;;  %253 = vmatprep.subr.mxu1 %v200_v21  ;;  %v67_v30 = vld [vmem:[#allocation3 + $0x58] sm:$0xff]  ;;  %v195_v31 = vld [vmem:[#allocation5 + $0xb0] sm:$0xff]  ;;  %v194_v33 = vld [vmem:[#allocation5 + $0xa8] sm:$0xff] }
  0x26   :  { %110 = vmatprep.subr.mxu0 %v77_v11  ;;  %254 = vmatpush1.msra.mxu1 %v199_v23  ;;  %v66_v32 = vld [vmem:[#allocation3 + $0x50] sm:$0xff]  ;;  %v65_v34 = vld [vmem:[#allocation3 + $0x48] sm:$0xff]  ;;  %v193_v35 = vld [vmem:[#allocation5 + $0xa0] sm:$0xff] }
  0x27   :  { %111 = vmatpush1.msra.mxu0 %v76_v12  ;;  %255 = vmatprep.subr.mxu1 %v198_v25  ;;  %v64_v36 = vld [vmem:[#allocation3 + $0x40] sm:$0xff]  ;;  %v192_v37 = vld [vmem:[#allocation5 + $0x98] sm:$0xff]  ;;  %v191_v39 = vld [vmem:[#allocation5 + $0x90] sm:$0xff] }
  0x28   :  { %112 = vmatprep.subr.mxu0 %v75_v13  ;;  %256 = vmatpush1.msra.mxu1 %v197_v27  ;;  %v63_v38 = vld [vmem:[#allocation3 + $0x38] sm:$0xff]  ;;  %v62_v40 = vld [vmem:[#allocation3 + $0x30] sm:$0xff]  ;;  %v190_v41 = vld [vmem:[#allocation5 + $0x88] sm:$0xff] }
  0x29   :  { %113 = vmatpush1.msra.mxu0 %v74_v14  ;;  %257 = vmatprep.subr.mxu1 %v196_v29  ;;  %v61_v42 = vld [vmem:[#allocation3 + $0x28] sm:$0xff]  ;;  %v189_v43 = vld [vmem:[#allocation5 + $0x80] sm:$0xff]  ;;  %v188_v45 = vld [vmem:[#allocation5 + $0x78] sm:$0xff] }
  0x2a   :  { %114 = vmatprep.subr.mxu0 %v73_v18  ;;  %258 = vmatpush1.msra.mxu1 %v195_v31  ;;  %v60_v44 = vld [vmem:[#allocation3 + $0x20] sm:$0xff]  ;;  %v59_v46 = vld [vmem:[#allocation3 + $0x18] sm:$0xff]  ;;  %v187_v47 = vld [vmem:[#allocation5 + $0x70] sm:$0xff] }
  0x2b   :  { %115 = vmatpush1.msra.mxu0 %v72_v20  ;;  %259 = vmatprep.subr.mxu1 %v194_v33  ;;  %v58_v48 = vld [vmem:[#allocation3 + $0x10] sm:$0xff]  ;;  %v186_v49 = vld [vmem:[#allocation5 + $0x68] sm:$0xff]  ;;  %v185_v51 = vld [vmem:[#allocation5 + $0x60] sm:$0xff] }
  0x2c   :  { %116 = vmatprep.subr.mxu0 %v71_v22  ;;  %260 = vmatpush1.msra.mxu1 %v193_v35  ;;  %v57_v50 = vld [vmem:[#allocation3 + $0x8] sm:$0xff]  ;;  %v56_v52 = vld [vmem:[#allocation3] sm:$0xff]  ;;  %v184_v53 = vld [vmem:[#allocation5 + $0x58] sm:$0xff] }
  0x2d   :  { %117 = vmatpush1.msra.mxu0 %v70_v24  ;;  %261 = vmatprep.subr.mxu1 %v192_v37  ;;  %v55_v54 = vld [vmem:[%s468_s0] sm:$0xff]  ;;  %v183_v55 = vld [vmem:[#allocation5 + $0x50] sm:$0xff]  ;;  %v182_v56 = vld [vmem:[#allocation5 + $0x48] sm:$0xff] }
  0x2e   :  { %118 = vmatprep.subr.mxu0 %v69_v26  ;;  %262 = vmatpush1.msra.mxu1 %v191_v39  ;;  %v181_v57 = vld [vmem:[#allocation5 + $0x40] sm:$0xff]  ;;  %v180_v58 = vld [vmem:[#allocation5 + $0x38] sm:$0xff]  ;;  %v179_v59 = vld [vmem:[#allocation5 + $0x30] sm:$0xff] }
  0x2f   :  { %119 = vmatpush1.msra.mxu0 %v68_v28  ;;  %263 = vmatprep.subr.mxu1 %v190_v41  ;;  %v178_v60 = vld [vmem:[#allocation5 + $0x28] sm:$0xff]  ;;  %v177_v61 = vld [vmem:[#allocation5 + $0x20] sm:$0xff]  ;;  %v176_v62 = vld [vmem:[#allocation5 + $0x18] sm:$0xff] }
  0x30   :  { %120 = vmatprep.subr.mxu0 %v67_v30  ;;  %264 = vmatpush1.msra.mxu1 %v189_v43  ;;  %v175_v63 = vld [vmem:[#allocation5 + $0x10] sm:$0xff]  ;;  %v174_v0 = vld [vmem:[#allocation5 + $0x8] sm:$0xff]  ;;  %v173_v1 = vld [vmem:[#allocation5] sm:$0xff] }
  0x31   :  { %121 = vmatpush1.msra.mxu0 %v66_v32  ;;  %265 = vmatprep.subr.mxu1 %v188_v45  ;;  %v236_v2 = vld [vmem:[#allocation5 + $0x1f8] sm:$0xff]  ;;  %v235_v3 = vld [vmem:[#allocation5 + $0x1f0] sm:$0xff]  ;;  %v234_v4 = vld [vmem:[#allocation5 + $0x1e8] sm:$0xff] }
  0x32   :  { %122 = vmatprep.subr.mxu0 %v65_v34  ;;  %266 = vmatpush1.msra.mxu1 %v187_v47  ;;  %v233_v5 = vld [vmem:[#allocation5 + $0x1e0] sm:$0xff]  ;;  %v232_v6 = vld [vmem:[#allocation5 + $0x1d8] sm:$0xff]  ;;  %v231_v7 = vld [vmem:[#allocation5 + $0x1d0] sm:$0xff]  ;;  %v90_v34 = vlaneseq }
  0x33   :  { %123 = vmatpush1.msra.mxu0 %v64_v36  ;;  %267 = vmatprep.subr.mxu1 %v186_v49  ;;  %v230_v8 = vld [vmem:[#allocation5 + $0x1c8] sm:$0xff]  ;;  %v229_v9 = vld [vmem:[#allocation5 + $0x1c0] sm:$0xff]  ;;  %v228_v10 = vld [vmem:[#allocation5 + $0x1b8] sm:$0xff] }
  0x34   :  { %124 = vmatprep.subr.mxu0 %v63_v38  ;;  %268 = vmatpush1.msra.mxu1 %v185_v51  ;;  %v227_v11 = vld [vmem:[#allocation5 + $0x1b0] sm:$0xff]  ;;  %v226_v12 = vld [vmem:[#allocation5 + $0x1a8] sm:$0xff]  ;;  %v225_v13 = vld [vmem:[#allocation5 + $0x1a0] sm:$0xff]  ;;  %v91_v35 = vshrl.u32 %v90_v34, 7 }
  0x35   :  { %125 = vmatpush1.msra.mxu0 %v62_v40  ;;  %269 = vmatprep.subr.mxu1 %v184_v53  ;;  %v224_v14 = vld [vmem:[#allocation5 + $0x198] sm:$0xff]  ;;  %v223_v15 = vld [vmem:[#allocation5 + $0x190] sm:$0xff]  ;;  %v222_v16 = vld [vmem:[#allocation5 + $0x188] sm:$0xff] }
  0x36   :  { %126 = vmatprep.subr.mxu0 %v61_v42  ;;  %270 = vmatpush1.msra.mxu1 %v183_v55  ;;  %v221_v17 = vld [vmem:[#allocation5 + $0x180] sm:$0xff]  ;;  %v220_v18 = vld [vmem:[#allocation5 + $0x178] sm:$0xff]  ;;  %v219_v19 = vld [vmem:[#allocation5 + $0x170] sm:$0xff]  ;;  %v92_v36 = vsub.s32 0, %v91_v35  ;;  %v96_v38 = vsub.s32 1, %v91_v35 }
  0x37   :  { %127 = vmatpush1.msra.mxu0 %v60_v44  ;;  %271 = vmatprep.subr.mxu1 %v182_v56  ;;  %v218_v20 = vld [vmem:[#allocation5 + $0x168] sm:$0xff]  ;;  %v217_v21 = vld [vmem:[#allocation5 + $0x160] sm:$0xff]  ;;  %v216_v22 = vld [vmem:[#allocation5 + $0x158] sm:$0xff] }
  0x38   :  { %128 = vmatprep.subr.mxu0 %v59_v46  ;;  %272 = vmatpush1.msra.mxu1 %v181_v57  ;;  %v215_v23 = vld [vmem:[#allocation5 + $0x150] sm:$0xff]  ;;  %v214_v24 = vld [vmem:[#allocation5 + $0x148] sm:$0xff]  ;;  %v213_v25 = vld [vmem:[#allocation5 + $0x140] sm:$0xff] }
  0x39   :  { %129 = vmatpush1.msra.mxu0 %v58_v48  ;;  %273 = vmatprep.subr.mxu1 %v180_v58  ;;  %v212_v26 = vld [vmem:[#allocation5 + $0x138] sm:$0xff]  ;;  %v211_v27 = vld [vmem:[#allocation5 + $0x130] sm:$0xff]  ;;  %v210_v28 = vld [vmem:[#allocation5 + $0x128] sm:$0xff] }
  0x3a   :  { %130 = vmatprep.subr.mxu0 %v57_v50  ;;  %274 = vmatpush1.msra.mxu1 %v179_v59  ;;  %v209_v29 = vld [vmem:[#allocation5 + $0x120] sm:$0xff]  ;;  %v208_v30 = vld [vmem:[#allocation5 + $0x118] sm:$0xff]  ;;  %v207_v31 = vld [vmem:[#allocation5 + $0x110] sm:$0xff] }
  0x3b   :  { %131 = vmatpush1.msra.mxu0 %v56_v52  ;;  %275 = vmatprep.subr.mxu1 %v178_v60  ;;  %v206_v32 = vld [vmem:[#allocation5 + $0x108] sm:$0xff]  ;;  %v205_v33 = vld [vmem:[#allocation5 + $0x100] sm:$0xff] }
  0x3c   :  { %165 = vmatmul.mubr.f32.vlgmr.msra.gmra.mxu0 %v55_v54  ;;  %276 = vmatpush1.msra.mxu1 %v177_v61  ;;  %v88_v37 = vld [vmem:[%s470_s2] sm:$0x3] }
  0x3d   :  { %277 = vmatprep.subr.mxu1 %v176_v62  ;;  %v93_v39 = vrot.slane %v88_v37, %v92_v36  ;;  %v97_v40 = vrot.slane %v88_v37, %v96_v38  ;;  %v237_v47 = vld [vmem:[%s472_s4] sm:$0x3]  ;;  %v340_v62 = vstv %s474_s6 }
  0x3e   :  { %278 = vmatpush1.msra.mxu1 %v175_v63  ;;  %v242_v48 = vrot.slane %v237_v47, %v92_v36  ;;  %v246_v49 = vrot.slane %v237_v47, %v96_v38  ;;  %v322_v51 = vld [vmem:[%s473_s5] sm:$0x3] }
  0x3f   :  { %279 = vmatprep.subr.mxu1 %v174_v0  ;;  %v327_v56 = vrot.slane %v322_v51, %v92_v36  ;;  %v331_v57 = vrot.slane %v322_v51, %v96_v38 }
  0x40   :  { %280 = vmatpush1.msra.mxu1 %v173_v1 }
  0x41   :  { %281 = vmatprep.subr.mxu1 %v236_v2 }
  0x42   :  { %282 = vmatpush2.msra.mxu1 %v235_v3 }
  0x43   :  { %283 = vmatprep.subr.mxu1 %v234_v4 }
  0x44   :  { %284 = vmatpush2.msra.mxu1 %v233_v5 }
  0x45   :  { %285 = vmatprep.subr.mxu1 %v232_v6 }
  0x46   :  { %286 = vmatpush2.msra.mxu1 %v231_v7 }
  0x47   :  { %287 = vmatprep.subr.mxu1 %v230_v8 }
  0x48   :  { %288 = vmatpush2.msra.mxu1 %v229_v9 }
  0x49   :  { %289 = vmatprep.subr.mxu1 %v228_v10 }
  0x4a   :  { %290 = vmatpush2.msra.mxu1 %v227_v11 }
  0x4b   :  { %291 = vmatprep.subr.mxu1 %v226_v12 }
  0x4c   :  { %292 = vmatpush2.msra.mxu1 %v225_v13 }
  0x4d   :  { %293 = vmatprep.subr.mxu1 %v224_v14 }
  0x4e   :  { %294 = vmatpush2.msra.mxu1 %v223_v15 }
  0x4f   :  { %295 = vmatprep.subr.mxu1 %v222_v16 }
  0x50   :  { %296 = vmatpush2.msra.mxu1 %v221_v17 }
  0x51   :  { %297 = vmatprep.subr.mxu1 %v220_v18 }
  0x52   :  { %298 = vmatpush2.msra.mxu1 %v219_v19 }
  0x53   :  { %299 = vmatprep.subr.mxu1 %v218_v20 }
  0x54   :  { %300 = vmatpush2.msra.mxu1 %v217_v21 }
  0x55   :  { %301 = vmatprep.subr.mxu1 %v216_v22 }
  0x56   :  { %302 = vmatpush2.msra.mxu1 %v215_v23 }
  0x57   :  { %303 = vmatprep.subr.mxu1 %v214_v24 }
  0x58   :  { %304 = vmatpush2.msra.mxu1 %v213_v25 }
  0x59   :  { %305 = vmatprep.subr.mxu1 %v212_v26 }
  0x5a   :  { %306 = vmatpush2.msra.mxu1 %v211_v27 }
  0x5b   :  { %307 = vmatprep.subr.mxu1 %v210_v28 }
  0x5c   :  { %308 = vmatpush2.msra.mxu1 %v209_v29 }
  0x5d   :  { %309 = vmatprep.subr.mxu1 %v208_v30 }
  0x5e   :  { %310 = vmatpush2.msra.mxu1 %v207_v31 }
  0x5f   :  { %311 = vmatprep.subr.mxu1 %v206_v32 }
  0x60   :  { %312 = vmatpush2.msra.mxu1 %v205_v33 }
  0xfc   :  { %v166_v41 = vpop.f32.mrf.mxu0 }
  0xfd   :  { %v167_v42 = vadd.f32 %v166_v41, %v93_v39 }
  0xfe   :  { %v168_v43 = vpop.f32.mrf.mxu0 }
  0xff   :  { %v169_v44 = vadd.f32 %v168_v43, %v97_v40  ;;  %v171_v46 = vmax.f32 %v167_v42, 0.0 }
 0x101   :  { %v172_v45 = vmax.f32 %v169_v44, 0.0 }
 0x103   :  { %313 = vmatprep.mubr.f32.mxu1 %v172_v45 }
 0x104   :  { %314 = vmatmul.mubr.f32.vlgmr.msra.gmra.mxu1 %v171_v46 }
 0x1c4   :  { %v315_v50 = vpop.f32.mrf.mxu1 }
 0x1c5   :  { %v316_v52 = vadd.f32 %v315_v50, %v242_v48 }
 0x1c6   :  { %v317_v53 = vpop.f32.mrf.mxu1 }
 0x1c7   :  { %v320_v54 = vmax.f32 %v316_v52, 0.0  ;;  %v318_v55 = vadd.f32 %v317_v53, %v246_v49 }
 0x1c9   :  { %v321_v58 = vmax.f32 %v318_v55, 0.0  ;;  %v334_v59 = vmul.f32 %v327_v56, %v320_v54 }
 0x1cb   :  { %v335_v60 = vmul.f32 %v331_v57, %v321_v58 }
 0x1cd   :  { %v336_v61 = vadd.f32 %v335_v60, %v334_v59 }
 0x1cf   :  { %337 = vadd.xlane.f32.xlu0 %v336_v61 }
 0x258   :  { %v338_v63 = vpop.xlane.xlu0 %337 }
 0x259   :  { %v341_v0 = vadd.f32 %v340_v62, %v338_v63 }
 0x25b   :  { %343 = vst.msk [vmem:[%s475_s7] sm:$0xff] %vm342_vm0, %v341_v0 }
 0x25c   :  { %348 = vsyncpa [#allocation4], 1 }
 0x25d   :  { %349 = vsyncpa [#allocation6], 1 }

</bundles_post_ra>
